<compile_context>
chip_gen: v7x
topology: tpu7x:2x2x1
jax: 0.10.0
libtpu: 0.0.40
codegen_flags: <defaults>
</compile_context>

<pallas_src>
import jax
import jax.numpy as jnp
from jax.experimental import pallas as pl
from jax.experimental.pallas import tpu as pltpu

EPS = 1e-5


def _round_up(x, m):
    return ((x + m - 1) // m) * m


# ---------------------------------------------------------------------------
# Kernel: x @ W1' + b1' -> ReLU -> @ W2' + b2' -> ReLU -> w3_row @ h2^T
# ---------------------------------------------------------------------------
def nn2_kernel(x_ref, w1_ref, b1_ref, w2_ref, b2_ref, w3_ref, o_ref):
    # fc1 (+ folded bn1), ReLU.  Dropout == identity in eval mode.
    h1 = jnp.dot(x_ref[...], w1_ref[...], preferred_element_type=jnp.float32)
    h1 = jnp.maximum(h1 + b1_ref[...], 0.0).astype(jnp.bfloat16)      # (tb, H1)

    # fc2 (+ folded bn2, zero-padded to 128 lanes + the b3 "bias lane"), ReLU.
    h2 = jnp.dot(h1, w2_ref[...], preferred_element_type=jnp.float32)
    h2 = jnp.maximum(h2 + b2_ref[...], 0.0)                           # (tb, H2p) f32

    # out layer: (1, H2p) @ (tb, H2p)^T -> lane-dense (1, tb) output row.
    # b3 is added for free via the 1.0 bias lane folded into b2f / w3_row.
    o_ref[...] = jax.lax.dot_general(
        w3_ref[...], h2, (((1,), (1,)), ((), ())),
        preferred_element_type=jnp.float32)


# ---------------------------------------------------------------------------
# Wrapper: 1-D grid over the batch, weights VMEM-resident, x streamed in bf16.
# ---------------------------------------------------------------------------
def nn2_forward(x, folded_params, *, tb=1024):
    """Fused NN2 eval-mode forward.  x: (B, input_dim) float32.  Sweep tb in
    512..2048 for production batches; on v7x keep tb <= padded_batch/2."""
    w1f, b1f, w2f, b2f, w3row = folded_params
    B, D = x.shape
    H1 = w1f.shape[1]
    H2p = w2f.shape[1]

    # Clamp the tile to the 128-rounded batch so small batches don't over-pad.
    tb = max(128, min(tb, _round_up(B, 128)))
    pb = _round_up(B, tb)

    # Stream x as bf16 (halves HBM traffic); accumulation stays f32 in-kernel.
    xb = x.astype(jnp.bfloat16)
    if pb != B:
        xb = jnp.pad(xb, ((0, pb - B), (0, 0)))

    grid = (pb // tb,)
    out = pl.pallas_call(
        nn2_kernel,
        out_shape=jax.ShapeDtypeStruct((1, pb), jnp.float32),
        grid=grid,
        in_specs=[
            # x: tiled over the batch, double-buffered against compute.
            pl.BlockSpec((tb, D), lambda i: (i, 0)),
            # Weights / biases: constant index_map -> stay resident in VMEM.
            pl.BlockSpec((D, H1), lambda i: (0, 0)),
            pl.BlockSpec((1, H1), lambda i: (0, 0)),
            pl.BlockSpec((H1, H2p), lambda i: (0, 0)),
            pl.BlockSpec((1, H2p), lambda i: (0, 0)),
            pl.BlockSpec((1, H2p), lambda i: (0, 0)),
        ],
        # Lane-dense output row per grid step (no 1-lane masked column stores).
        out_specs=pl.BlockSpec((1, tb), lambda i: (0, i)),
        compiler_params=pltpu.CompilerParams(
            dimension_semantics=("parallel",)),
    )(xb, w1f, b1f, w2f, b2f, w3row)

    return out.reshape(-1, 1)[:B]


# ---------------------------------------------------------------------------
# Parameters (same shapes as the PyTorch module) + one-time folding.
# ---------------------------------------------------------------------------
def init_params(key, input_dim, hidden_neurons=128):
    """Deterministic synthetic parameters matching NN2.__init__ shapes."""
    h1 = hidden_neurons
    h2 = hidden_neurons // 2
    ks = jax.random.split(key, 8)

    def row(k, n, scale=0.05):
        return (scale * jax.random.normal(k, (1, n))).astype(jnp.float32)

    w1 = (0.1 * jax.random.normal(ks[0], (input_dim, h1))).astype(jnp.float32)
    b1 = row(ks[1], h1)
    g1 = 1.0 + row(ks[2], h1)              # bn1 weight (gamma)
    be1 = row(ks[3], h1)                   # bn1 bias (beta)
    m1 = row(ks[4], h1)                    # bn1 running_mean
    v1 = 1.0 + jnp.abs(row(ks[5], h1))     # bn1 running_var (>0)

    ks2 = jax.random.split(ks[6], 8)
    w2 = (0.1 * jax.random.normal(ks2[0], (h1, h2))).astype(jnp.float32)
    b2 = row(ks2[1], h2)
    g2 = 1.0 + row(ks2[2], h2)
    be2 = row(ks2[3], h2)
    m2 = row(ks2[4], h2)
    v2 = 1.0 + jnp.abs(row(ks2[5], h2))

    ks3 = jax.random.split(ks[7], 2)
    w3 = (0.1 * jax.random.normal(ks3[0], (h2, 1))).astype(jnp.float32)
    b3 = row(ks3[1], 1)

    return (w1, b1, g1, be1, m1, v1,
            w2, b2, g2, be2, m2, v2,
            w3, b3)


def fold_params(params):
    """One-time constant fold: BN(eval) + bias into the Linear weights,
    zero-pad layer 2 to 128 lanes, and fold b3 into a spare 'bias lane'."""
    (w1, b1, g1, be1, m1, v1,
     w2, b2, g2, be2, m2, v2,
     w3, b3) = params

    s1 = g1 * jax.lax.rsqrt(v1 + EPS)            # (1, H1)
    w1f = w1 * s1                                # (D, H1)
    b1f = (b1 - m1) * s1 + be1

    s2 = g2 * jax.lax.rsqrt(v2 + EPS)            # (1, H2)
    w2f = w2 * s2                                # (H1, H2)
    b2f = (b2 - m2) * s2 + be2
    w3row = w3.T                                 # (1, H2)

    # Pad layer 2 to a full 128-lane width with at least one spare lane, then
    # use the first spare lane to carry b3:
    #   w2f[:, H2] = 0, b2f[0, H2] = 1.0  -> ReLU output of that lane is 1.0
    #   w3row[0, H2] = b3                 -> final dot adds b3 exactly
    # All other padded lanes stay zero so they contribute nothing.
    H2 = w2f.shape[1]
    H2p = _round_up(H2 + 1, 128)
    pad = H2p - H2
    w2f = jnp.pad(w2f, ((0, 0), (0, pad)))
    b2f = jnp.pad(b2f, ((0, 0), (0, pad))).at[0, H2].set(1.0)
    w3row = jnp.pad(w3row, ((0, 0), (0, pad))).at[0, H2].set(b3[0, 0])

    return (w1f.astype(jnp.bfloat16), b1f.astype(jnp.float32),
            w2f.astype(jnp.bfloat16), b2f.astype(jnp.float32),
            w3row.astype(jnp.float32))


# ---------------------------------------------------------------------------
# Pure-JAX f32 reference (unfused, eval-mode NN2) for correctness checking.
# ---------------------------------------------------------------------------
def reference_forward(x, params):
    (w1, b1, g1, be1, m1, v1,
     w2, b2, g2, be2, m2, v2,
     w3, b3) = params

    def bn(h, gamma, beta, mean, var):
        return (h - mean) * jax.lax.rsqrt(var + EPS) * gamma + beta

    h = jnp.maximum(bn(x @ w1 + b1, g1, be1, m1, v1), 0.0)
    h = jnp.maximum(bn(h @ w2 + b2, g2, be2, m2, v2), 0.0)
    return h @ w3 + b3


if __name__ == "__main__":
    key = jax.random.PRNGKey(0)
    k_x, k_p = jax.random.split(key)

    batch = 200          # not a multiple of 128 -> exercises padding path
    input_dim = 32
    hidden = 128

    x = jax.random.normal(k_x, (batch, input_dim), dtype=jnp.float32)
    params = init_params(k_p, input_dim, hidden)
    folded = fold_params(params)          # one-time offline fold

    out = nn2_forward(x, folded)
    out = jax.block_until_ready(out)

    ref = reference_forward(x, params)
    assert out.shape == (batch, 1)
    # bf16 matmul operands (f32 accumulation) vs. f32 reference -> loosened tol.
    assert jnp.allclose(out, ref, atol=5e-2, rtol=5e-2), "mismatch vs reference"

    print("KERNEL_OK")
</pallas_src>

<mosaic_0001>
module attributes {stable_mosaic.version = 11 : i64} {
  func.func @nn2_kernel(%arg0: i32, %arg1: memref<256x32xbf16, #tpu.memory_space<vmem>>, %arg2: memref<32x128xbf16, #tpu.memory_space<vmem>>, %arg3: memref<1x128xf32, #tpu.memory_space<vmem>>, %arg4: memref<128x128xbf16, #tpu.memory_space<vmem>>, %arg5: memref<1x128xf32, #tpu.memory_space<vmem>>, %arg6: memref<1x128xf32, #tpu.memory_space<vmem>>, %arg7: memref<1x256xf32, #tpu.memory_space<vmem>>) attributes {dimension_semantics = [#tpu.dimension_semantics<parallel>], iteration_bounds = array<i64: 1>, scalar_prefetch = 0 : i64, scratch_operands = 0 : i64, tpu.core_type = #tpu.core_type<tc>, window_params = [{transform_indices = @transform_0, window_bounds = array<i64: 256, 32>}, {pipeline_mode = #tpu.pipeline_mode<synchronous>, transform_indices = @transform_1, window_bounds = array<i64: 32, 128>}, {pipeline_mode = #tpu.pipeline_mode<synchronous>, transform_indices = @transform_2, window_bounds = array<i64: 1, 128>}, {pipeline_mode = #tpu.pipeline_mode<synchronous>, transform_indices = @transform_3, window_bounds = array<i64: 128, 128>}, {pipeline_mode = #tpu.pipeline_mode<synchronous>, transform_indices = @transform_4, window_bounds = array<i64: 1, 128>}, {pipeline_mode = #tpu.pipeline_mode<synchronous>, transform_indices = @transform_5, window_bounds = array<i64: 1, 128>}, {transform_indices = @transform_6, window_bounds = array<i64: 1, 256>}]} {
    %c0 = arith.constant 0 : index
    %c0_0 = arith.constant 0 : index
    %0 = vector.load %arg1[%c0, %c0_0] : memref<256x32xbf16, #tpu.memory_space<vmem>>, vector<256x32xbf16>
    %c0_1 = arith.constant 0 : index
    %c0_2 = arith.constant 0 : index
    %1 = vector.load %arg2[%c0_1, %c0_2] : memref<32x128xbf16, #tpu.memory_space<vmem>>, vector<32x128xbf16>
    %cst = arith.constant dense<0.000000e+00> : vector<256x128xf32>
    %2 = tpu.matmul %0, %1, %cst {dimension_numbers = #tpu.dot_dimension_numbers<[1], [0], [0], [1], [0, 0, 1, 1], [], []>} : vector<256x32xbf16>, vector<32x128xbf16>, vector<256x128xf32> -> vector<256x128xf32>
    %c0_3 = arith.constant 0 : index
    %c0_4 = arith.constant 0 : index
    %3 = vector.load %arg3[%c0_3, %c0_4] : memref<1x128xf32, #tpu.memory_space<vmem>>, vector<1x128xf32>
    %4 = vector.broadcast %3 : vector<1x128xf32> to vector<256x128xf32>
    %5 = arith.addf %2, %4 : vector<256x128xf32>
    %cst_5 = arith.constant 0.000000e+00 : f32
    %6 = vector.broadcast %cst_5 : f32 to vector<256x128xf32>
    %7 = arith.maximumf %5, %6 : vector<256x128xf32>
    %8 = arith.truncf %7 : vector<256x128xf32> to vector<256x128xbf16>
    %c0_6 = arith.constant 0 : index
    %c0_7 = arith.constant 0 : index
    %9 = vector.load %arg4[%c0_6, %c0_7] : memref<128x128xbf16, #tpu.memory_space<vmem>>, vector<128x128xbf16>
    %cst_8 = arith.constant dense<0.000000e+00> : vector<256x128xf32>
    %10 = tpu.matmul %8, %9, %cst_8 {dimension_numbers = #tpu.dot_dimension_numbers<[1], [0], [0], [1], [0, 0, 1, 1], [], []>} : vector<256x128xbf16>, vector<128x128xbf16>, vector<256x128xf32> -> vector<256x128xf32>
    %c0_9 = arith.constant 0 : index
    %c0_10 = arith.constant 0 : index
    %11 = vector.load %arg5[%c0_9, %c0_10] : memref<1x128xf32, #tpu.memory_space<vmem>>, vector<1x128xf32>
    %12 = vector.broadcast %11 : vector<1x128xf32> to vector<256x128xf32>
    %13 = arith.addf %10, %12 : vector<256x128xf32>
    %cst_11 = arith.constant 0.000000e+00 : f32
    %14 = vector.broadcast %cst_11 : f32 to vector<256x128xf32>
    %15 = arith.maximumf %13, %14 : vector<256x128xf32>
    %c0_12 = arith.constant 0 : index
    %c0_13 = arith.constant 0 : index
    %16 = vector.load %arg6[%c0_12, %c0_13] : memref<1x128xf32, #tpu.memory_space<vmem>>, vector<1x128xf32>
    %cst_14 = arith.constant dense<0.000000e+00> : vector<1x256xf32>
    %17 = tpu.matmul %16, %15, %cst_14 {dimension_numbers = #tpu.dot_dimension_numbers<[1], [1], [0], [0], [0, 0, 1, 0], [], []>} : vector<1x128xf32>, vector<256x128xf32>, vector<1x256xf32> -> vector<1x256xf32>
    %c0_15 = arith.constant 0 : index
    %c0_16 = arith.constant 0 : index
    %18 = vector.load %arg7[%c0_15, %c0_16] : memref<1x256xf32, #tpu.memory_space<vmem>>, vector<1x256xf32>
    tpu.vector_store %arg7[%c0_15, %c0_16], %17 {strides = array<i32>} : memref<1x256xf32, #tpu.memory_space<vmem>>, vector<1x256xf32>,
    return
  }
  func.func @transform_0(%arg0: i32) -> (i32, i32) {
    %c0_i32 = arith.constant 0 : i32
    %c0_i32_0 = arith.constant 0 : i32
    return %arg0, %c0_i32 : i32, i32
  }
  func.func @transform_1(%arg0: i32) -> (i32, i32) {
    %c0_i32 = arith.constant 0 : i32
    %c0_i32_0 = arith.constant 0 : i32
    %c0_i32_1 = arith.constant 0 : i32
    return %c0_i32, %c0_i32_0 : i32, i32
  }
  func.func @transform_2(%arg0: i32) -> (i32, i32) {
    %c0_i32 = arith.constant 0 : i32
    %c0_i32_0 = arith.constant 0 : i32
    %c0_i32_1 = arith.constant 0 : i32
    return %c0_i32, %c0_i32_0 : i32, i32
  }
  func.func @transform_3(%arg0: i32) -> (i32, i32) {
    %c0_i32 = arith.constant 0 : i32
    %c0_i32_0 = arith.constant 0 : i32
    %c0_i32_1 = arith.constant 0 : i32
    return %c0_i32, %c0_i32_0 : i32, i32
  }
  func.func @transform_4(%arg0: i32) -> (i32, i32) {
    %c0_i32 = arith.constant 0 : i32
    %c0_i32_0 = arith.constant 0 : i32
    %c0_i32_1 = arith.constant 0 : i32
    return %c0_i32, %c0_i32_0 : i32, i32
  }
  func.func @transform_5(%arg0: i32) -> (i32, i32) {
    %c0_i32 = arith.constant 0 : i32
    %c0_i32_0 = arith.constant 0 : i32
    %c0_i32_1 = arith.constant 0 : i32
    return %c0_i32, %c0_i32_0 : i32, i32
  }
  func.func @transform_6(%arg0: i32) -> (i32, i32) {
    %c0_i32 = arith.constant 0 : i32
    %c0_i32_0 = arith.constant 0 : i32
    return %c0_i32, %arg0 : i32, i32
  }
}

</mosaic_0001>

<bundles_post_ra>
// kernel: tpu_custom_call.1
= control target key start
LH: loop header
LB: loop body
LE: loop exit
PB: predicated region body
PF: predicated region fallthrough
CT: control target
= control target key end

     0   :  { %vm160_vm0 = vcmask 261120   ;;  %s1327_s0 = inlined_call_operand.vmem [shape: bf16[256,32], index: 0, kind: input, shape index: {}]   ;;  %s1328_s1 = inlined_call_operand.vmem [shape: bf16[32,128], index: 1, kind: input, shape index: {}]   ;;  %s1329_s2 = inlined_call_operand.vmem [shape: f32[1,128], index: 2, kind: input, shape index: {}]   ;;  %s1330_s3 = inlined_call_operand.vmem [shape: bf16[128,128], index: 3, kind: input, shape index: {}]   ;;  %s1331_s4 = inlined_call_operand.vmem [shape: f32[1,128], index: 4, kind: input, shape index: {}]   ;;  %s1332_s5 = inlined_call_operand.vmem [shape: f32[1,128], index: 5, kind: input, shape index: {}]   ;;  %s1333_s6 = inlined_call_operand.hbm [shape: f32[1,256], index: 6, kind: output, shape index: {}]  }
   0x1   :  { %v1029_v0 = vld [vmem:[%s1328_s1] sm:$0xff]   ;;  %v1030_v1 = vld [vmem:[%s1328_s1 + $0x8] sm:$0xff]   ;;  %v1033_v4 = vld [vmem:[%s1327_s0 + $0x10] sm:$0xff]  }
   0x2   :  { %911 = vmatprep.subr.bf16.mxu0 %v1029_v0  ;;  %v1031_v2 = vld [vmem:[%s1327_s0] sm:$0xff]   ;;  %v1032_v3 = vld [vmem:[%s1327_s0 + $0x8] sm:$0xff]   ;;  %v1034_v5 = vld [vmem:[%s1327_s0 + $0x18] sm:$0xff]  }
   0x3   :  { %912 = vmatpush3.bf16.msra.mxu0 %v1029_v0  ;;  %915 = vmatprep.mubr.msk.bf16.mxu0 %vm160_vm0, %v1031_v2  ;;  %v1035_v6 = vld [vmem:[%s1327_s0 + $0x20] sm:$0xff]   ;;  %v1048_v8 = vld [vmem:[%s1330_s3 + $0x8] sm:$0xff]   ;;  %v1049_v10 = vld [vmem:[%s1330_s3 + $0x10] sm:$0xff]  }
   0x4   :  { %913 = vmatprep.subr.bf16.mxu0 %v1030_v1  ;;  %v1047_v7 = vld [vmem:[%s1330_s3] sm:$0xff]   ;;  %v1036_v9 = vld [vmem:[%s1327_s0 + $0x28] sm:$0xff]   ;;  %v1037_v11 = vld [vmem:[%s1327_s0 + $0x30] sm:$0xff]  }
   0x5   :  { %947 = vmatprep.subr.bf16.mxu1 %v1047_v7 }
   0x6   :  { %948 = vmatpush3.bf16.msra.mxu1 %v1047_v7 }
   0x7   :  { %914 = vmatpush3.bf16.msra.mxu0 %v1030_v1  ;;  %949 = vmatprep.subr.bf16.mxu1 %v1048_v8 }
   0xa   :  { %916 = vmatmul.mubr.msk.bf16.vlgmr.msra.gmra.mrb[0].mxu0 %vm160_vm0, %v1032_v3  ;;  %950 = vmatpush3.bf16.msra.mxu1 %v1048_v8 }
   0xb   :  { %919 = vmatprep.mubr.msk.bf16.mxu0 %vm160_vm0, %v1033_v4 }
  0x12   :  { %920 = vmatmul.mubr.msk.bf16.gmra.mrb[4].mxu0 %vm160_vm0, %v1034_v5 }
  0x13   :  { %923 = vmatprep.mubr.msk.bf16.mxu0 %vm160_vm0, %v1035_v6 }
  0x14   :  { %11 = vsyncpa [#allocation3], 0  ;;  %951 = vmatprep.subr.bf16.mxu1 %v1049_v10  ;;  %v1050_v12 = vld [vmem:[%s1330_s3 + $0x18] sm:$0xff]   ;;  %v1051_v14 = vld [vmem:[%s1330_s3 + $0x20] sm:$0xff]  }
  0x15   :  { %952 = vmatpush3.bf16.msra.mxu1 %v1049_v10  ;;  %v1038_v13 = vld [vmem:[%s1327_s0 + $0x38] sm:$0xff]   ;;  %v1039_v15 = vld [vmem:[%s1327_s0 + $0x40] sm:$0xff]   ;;  %v1052_v16 = vld [vmem:[%s1330_s3 + $0x28] sm:$0xff]  }
  0x16   :  { %953 = vmatprep.subr.bf16.mxu1 %v1050_v12  ;;  %v1040_v17 = vld [vmem:[%s1327_s0 + $0x48] sm:$0xff]   ;;  %v1041_v18 = vld [vmem:[%s1327_s0 + $0x50] sm:$0xff]   ;;  %v1042_v19 = vld [vmem:[%s1327_s0 + $0x58] sm:$0xff]  }
  0x17   :  { %v1043_v20 = vld [vmem:[%s1327_s0 + $0x60] sm:$0xff]   ;;  %v1044_v21 = vld [vmem:[%s1327_s0 + $0x68] sm:$0xff]   ;;  %v1045_v22 = vld [vmem:[%s1327_s0 + $0x70] sm:$0xff]  }
  0x18   :  { %v1046_v23 = vld [vmem:[%s1327_s0 + $0x78] sm:$0xff]   ;;  %v1053_v24 = vld [vmem:[%s1330_s3 + $0x30] sm:$0xff]   ;;  %v1213_v26 = vld [vmem:[%s1329_s2] ss:$0 sm:$0xff] }
  0x19   :  { %954 = vmatpush3.bf16.msra.mxu1 %v1050_v12  ;;  %v1054_v25 = vld [vmem:[%s1330_s3 + $0x38] sm:$0xff]  }
  0x1a   :  { %924 = vmatmul.mubr.msk.bf16.gmra.mrb[8].mxu0 %vm160_vm0, %v1036_v9  ;;  %955 = vmatprep.subr.bf16.mxu1 %v1051_v14 }
  0x1b   :  { %927 = vmatprep.mubr.msk.bf16.mxu0 %vm160_vm0, %v1037_v11 }
  0x1d   :  { %956 = vmatpush3.bf16.msra.mxu1 %v1051_v14 }
  0x1e   :  { %957 = vmatprep.subr.bf16.mxu1 %v1052_v16 }
  0x21   :  { %958 = vmatpush3.bf16.msra.mxu1 %v1052_v16 }
  0x22   :  { %928 = vmatmul.mubr.msk.bf16.gmra.mrb[12].mxu0 %vm160_vm0, %v1038_v13  ;;  %959 = vmatprep.subr.bf16.mxu1 %v1053_v24 }
  0x23   :  { %931 = vmatprep.mubr.msk.bf16.mxu0 %vm160_vm0, %v1039_v15 }
  0x25   :  { %960 = vmatpush3.bf16.msra.mxu1 %v1053_v24 }
  0x26   :  { %961 = vmatprep.subr.bf16.mxu1 %v1054_v25 }
  0x29   :  { %962 = vmatpush3.bf16.msra.mxu1 %v1054_v25 }
  0x2a   :  { %932 = vmatmul.mubr.msk.bf16.gmra.mrb[16].mxu0 %vm160_vm0, %v1040_v17 }
  0x2b   :  { %935 = vmatprep.mubr.msk.bf16.mxu0 %vm160_vm0, %v1041_v18 }
  0x32   :  { %936 = vmatmul.mubr.msk.bf16.gmra.mrb[20].mxu0 %vm160_vm0, %v1042_v19 }
  0x33   :  { %939 = vmatprep.mubr.msk.bf16.mxu0 %vm160_vm0, %v1043_v20 }
  0x3a   :  { %940 = vmatmul.mubr.msk.bf16.gmra.mrb[24].mxu0 %vm160_vm0, %v1044_v21 }
  0x3b   :  { %943 = vmatprep.mubr.msk.bf16.mxu0 %vm160_vm0, %v1045_v22 }
  0x42   :  { %944 = vmatmul.mubr.msk.bf16.gmra.mrb[28].mxu0 %vm160_vm0, %v1046_v23 }
  0xdd   :  { %v917_v27 = vpop.f32.mrb[0].mxu0 }
  0xde   :  { %v252_v28 = vadd.f32 %v917_v27, %v1213_v26  ;;  %v243_v29 = vpop.f32.mrb[1].mxu0 }
  0xdf   :  { %v244_v30 = vadd.f32 %v1213_v26, %v243_v29  ;;  %v918_v31 = vpop.f32.mrb[2].mxu0 }
  0xe0   :  { %v255_v32 = vadd.f32 %v918_v31, %v1213_v26  ;;  %v246_v33 = vpop.f32.mrb[3].mxu0  ;;  %v372_v35 = vmax.f32 %v252_v28, 0.0 }
  0xe1   :  { %v247_v34 = vadd.f32 %v1213_v26, %v246_v33  ;;  %v370_v37 = vmax.f32 %v244_v30, 0.0 }
  0xe2   :  { %v373_v36 = vmax.f32 %v255_v32, 0.0 }
  0xe3   :  { %v371_v38 = vmax.f32 %v247_v34, 0.0 }
  0xe4   :  { %v403_v39 = vpack.c.bf16 %v373_v36, %v372_v35 }
  0xe5   :  { %v921_v40 = vpop.f32.mrb[4].mxu0  ;;  %v402_v41 = vpack.c.bf16 %v371_v38, %v370_v37 }
  0xe6   :  { %v268_v42 = vadd.f32 %v921_v40, %v1213_v26  ;;  %v259_v43 = vpop.f32.mrb[5].mxu0 }
  0xe7   :  { %v260_v44 = vadd.f32 %v1213_v26, %v259_v43  ;;  %v922_v45 = vpop.f32.mrb[6].mxu0  ;;  %963 = vmatprep.mubr.bf16.mxu1 %v402_v41 }
  0xe8   :  { %v271_v46 = vadd.f32 %v922_v45, %v1213_v26  ;;  %v262_v47 = vpop.f32.mrb[7].mxu0  ;;  %964 = vmatmul.mubr.bf16.vlgmr.msra.gmra.mrb[0].mxu1 %v403_v39  ;;  %v376_v49 = vmax.f32 %v268_v42, 0.0 }
  0xe9   :  { %v263_v48 = vadd.f32 %v1213_v26, %v262_v47  ;;  %v374_v51 = vmax.f32 %v260_v44, 0.0 }
  0xea   :  { %v377_v50 = vmax.f32 %v271_v46, 0.0 }
  0xeb   :  { %v375_v52 = vmax.f32 %v263_v48, 0.0 }
  0xec   :  { %v405_v53 = vpack.c.bf16 %v377_v50, %v376_v49 }
  0xed   :  { %v404_v54 = vpack.c.bf16 %v375_v52, %v374_v51  ;;  %v925_v55 = vpop.f32.mrb[8].mxu0 }
  0xee   :  { %v284_v56 = vadd.f32 %v925_v55, %v1213_v26  ;;  %v275_v57 = vpop.f32.mrb[9].mxu0 }
  0xef   :  { %v276_v58 = vadd.f32 %v1213_v26, %v275_v57  ;;  %v926_v59 = vpop.f32.mrb[10].mxu0  ;;  %967 = vmatprep.mubr.bf16.mxu1 %v404_v54 }
  0xf0   :  { %v287_v60 = vadd.f32 %v926_v59, %v1213_v26  ;;  %v278_v61 = vpop.f32.mrb[11].mxu0  ;;  %968 = vmatmul.mubr.bf16.gmra.mrb[4].mxu1 %v405_v53  ;;  %v380_v63 = vmax.f32 %v284_v56, 0.0 }
  0xf1   :  { %v279_v62 = vadd.f32 %v1213_v26, %v278_v61  ;;  %v378_v1 = vmax.f32 %v276_v58, 0.0 }
  0xf2   :  { %v381_v0 = vmax.f32 %v287_v60, 0.0 }
  0xf3   :  { %v379_v2 = vmax.f32 %v279_v62, 0.0 }
  0xf4   :  { %v407_v3 = vpack.c.bf16 %v381_v0, %v380_v63 }
  0xf5   :  { %v406_v4 = vpack.c.bf16 %v379_v2, %v378_v1  ;;  %v929_v5 = vpop.f32.mrb[12].mxu0 }
  0xf6   :  { %v300_v6 = vadd.f32 %v929_v5, %v1213_v26  ;;  %v291_v7 = vpop.f32.mrb[13].mxu0 }
  0xf7   :  { %v292_v8 = vadd.f32 %v1213_v26, %v291_v7  ;;  %v930_v9 = vpop.f32.mrb[14].mxu0  ;;  %971 = vmatprep.mubr.bf16.mxu1 %v406_v4 }
  0xf8   :  { %v303_v10 = vadd.f32 %v930_v9, %v1213_v26  ;;  %v294_v11 = vpop.f32.mrb[15].mxu0  ;;  %972 = vmatmul.mubr.bf16.gmra.mrb[8].mxu1 %v407_v3  ;;  %v384_v13 = vmax.f32 %v300_v6, 0.0 }
  0xf9   :  { %v295_v12 = vadd.f32 %v1213_v26, %v294_v11  ;;  %v382_v15 = vmax.f32 %v292_v8, 0.0 }
  0xfa   :  { %v385_v14 = vmax.f32 %v303_v10, 0.0 }
  0xfb   :  { %v383_v16 = vmax.f32 %v295_v12, 0.0  ;;  %v1250_v12 = vld [vmem:[%s1332_s5] sm:$0x1] }
  0xfc   :  { %v409_v17 = vpack.c.bf16 %v385_v14, %v384_v13  ;;  %909 = vmatprep.mubr.f32.mxu0 %v1250_v12  ;;  %v1256_v13 = vld [vmem:[%s1331_s4] ss:$0 sm:$0xff]  ;;  %s1080_s4 = smov [#allocation2]  }
  0xfd   :  { %v408_v18 = vpack.c.bf16 %v383_v16, %v382_v15  ;;  %v933_v19 = vpop.f32.mrb[16].mxu0  ;;  %s783_s5 = sshll.u32 %s1080_s4, 4  ;;  %s784_s5 = int_to_ptr.vmem [resolvable:$true] %s783_s5 }
  0xfe   :  { %v316_v20 = vadd.f32 %v933_v19, %v1213_v26  ;;  %v307_v21 = vpop.f32.mrb[17].mxu0  ;;  %s1055_s26 = scalar_lea.vmem %s784_s5, 32  ;;  %p1060_p1 = scmp.lt.s32.totalorder %s784_s5, %s784_s5 }
  0xff   :  { %v308_v22 = vadd.f32 %v1213_v26, %v307_v21  ;;  %v934_v23 = vpop.f32.mrb[18].mxu0  ;;  %975 = vmatprep.mubr.bf16.mxu1 %v408_v18  ;;  %p1056_p0 = scmp.ne.s32.totalorder %s784_s5, %s1055_s26  ;;  %p1061_p2 = scmp.lt.s32.totalorder %s1055_s26, %s1055_s26 }
 0x100   :  { %v319_v24 = vadd.f32 %v934_v23, %v1213_v26  ;;  %v310_v25 = vpop.f32.mrb[19].mxu0  ;;  %976 = vmatmul.mubr.bf16.gmra.mrb[12].mxu1 %v409_v17  ;;  %v388_v28 = vmax.f32 %v316_v20, 0.0 }
 0x101   :  { %v311_v27 = vadd.f32 %v1213_v26, %v310_v25  ;;  %v386_v30 = vmax.f32 %v308_v22, 0.0  ;;  %p1062_p3 = por %p1061_p2, %p1060_p1 }
 0x102   :  { %v389_v29 = vmax.f32 %v319_v24, 0.0 }
 0x103   :  { %v387_v31 = vmax.f32 %v311_v27, 0.0  ;;  %p1063_p4 = pnand %p1062_p3, %p1056_p0 }
 0x104   :  { %v411_v32 = vpack.c.bf16 %v389_v29, %v388_v28 }
 0x105   :  { %v410_v33 = vpack.c.bf16 %v387_v31, %v386_v30  ;;  %v937_v34 = vpop.f32.mrb[20].mxu0 }
 0x106   :  { %v332_v35 = vadd.f32 %v937_v34, %v1213_v26  ;;  %v323_v36 = vpop.f32.mrb[21].mxu0 }
 0x107   :  { %v324_v37 = vadd.f32 %v1213_v26, %v323_v36  ;;  %979 = vmatprep.mubr.bf16.mxu1 %v410_v33  ;;  %v938_v38 = vpop.f32.mrb[22].mxu0 }
 0x108   :  { %v392_v39 = vmax.f32 %v332_v35, 0.0  ;;  %v335_v40 = vadd.f32 %v938_v38, %v1213_v26  ;;  %980 = vmatmul.mubr.bf16.gmra.mrb[16].mxu1 %v411_v32  ;;  %v326_v41 = vpop.f32.mrb[23].mxu0 }
 0x109   :  { %v390_v42 = vmax.f32 %v324_v37, 0.0  ;;  %v327_v43 = vadd.f32 %v1213_v26, %v326_v41 }
 0x10a   :  { %v393_v44 = vmax.f32 %v335_v40, 0.0 }
 0x10b   :  { %v391_v45 = vmax.f32 %v327_v43, 0.0 }
 0x10c   :  { %v413_v46 = vpack.c.bf16 %v393_v44, %v392_v39 }
 0x10d   :  { %v412_v47 = vpack.c.bf16 %v391_v45, %v390_v42  ;;  %v941_v48 = vpop.f32.mrb[24].mxu0 }
 0x10e   :  { %v348_v49 = vadd.f32 %v941_v48, %v1213_v26  ;;  %v339_v50 = vpop.f32.mrb[25].mxu0 }
 0x10f   :  { %983 = vmatprep.mubr.bf16.mxu1 %v412_v47  ;;  %v340_v51 = vadd.f32 %v1213_v26, %v339_v50  ;;  %v942_v52 = vpop.f32.mrb[26].mxu0 }
 0x110   :  { %984 = vmatmul.mubr.bf16.gmra.mrb[20].mxu1 %v413_v46  ;;  %v396_v53 = vmax.f32 %v348_v49, 0.0  ;;  %v351_v54 = vadd.f32 %v942_v52, %v1213_v26  ;;  %v342_v55 = vpop.f32.mrb[27].mxu0 }
 0x111   :  { %v394_v56 = vmax.f32 %v340_v51, 0.0  ;;  %v343_v57 = vadd.f32 %v1213_v26, %v342_v55 }
 0x112   :  { %v397_v58 = vmax.f32 %v351_v54, 0.0 }
 0x113   :  { %v395_v59 = vmax.f32 %v343_v57, 0.0 }
 0x114   :  { %v415_v60 = vpack.c.bf16 %v397_v58, %v396_v53 }
 0x115   :  { %v414_v61 = vpack.c.bf16 %v395_v59, %v394_v56  ;;  %v945_v62 = vpop.f32.mrb[28].mxu0 }
 0x116   :  { %v364_v63 = vadd.f32 %v945_v62, %v1213_v26  ;;  %v355_v0 = vpop.f32.mrb[29].mxu0 }
 0x117   :  { %987 = vmatprep.mubr.bf16.mxu1 %v414_v61  ;;  %v356_v1 = vadd.f32 %v1213_v26, %v355_v0  ;;  %v946_v2 = vpop.f32.mrb[30].mxu0 }
 0x118   :  { %988 = vmatmul.mubr.bf16.gmra.mrb[24].mxu1 %v415_v60  ;;  %v400_v3 = vmax.f32 %v364_v63, 0.0  ;;  %v367_v4 = vadd.f32 %v946_v2, %v1213_v26  ;;  %v358_v5 = vpop.f32.mrb[31].mxu0 }
 0x119   :  { %v398_v6 = vmax.f32 %v356_v1, 0.0  ;;  %v359_v7 = vadd.f32 %v1213_v26, %v358_v5 }
 0x11a   :  { %v401_v8 = vmax.f32 %v367_v4, 0.0 }
 0x11b   :  { %v399_v9 = vmax.f32 %v359_v7, 0.0 }
 0x11c   :  { %v417_v10 = vpack.c.bf16 %v401_v8, %v400_v3 }
 0x11d   :  { %v416_v11 = vpack.c.bf16 %v399_v9, %v398_v6 }
 0x11f   :  { %991 = vmatprep.mubr.bf16.mxu1 %v416_v11 }
 0x120   :  { %992 = vmatmul.mubr.bf16.gmra.mrb[28].mxu1 %v417_v10 }
 0x1bb   :  { %v965_v14 = vpop.f32.mrb[0].mxu1 }
 0x1bc   :  { %v532_v26 = vadd.f32 %v965_v14, %v1256_v13  ;;  %v523_v15 = vpop.f32.mrb[1].mxu1 }
 0x1bd   :  { %v524_v16 = vadd.f32 %v1256_v13, %v523_v15  ;;  %v966_v17 = vpop.f32.mrb[2].mxu1 }
 0x1be   :  { %v535_v18 = vadd.f32 %v966_v17, %v1256_v13  ;;  %v526_v19 = vpop.f32.mrb[3].mxu1  ;;  %v652_v21 = vmax.f32 %v532_v26, 0.0 }
 0x1bf   :  { %v527_v20 = vadd.f32 %v1256_v13, %v526_v19  ;;  %v650_v23 = vmax.f32 %v524_v16, 0.0 }
 0x1c0   :  { %v653_v22 = vmax.f32 %v535_v18, 0.0 }
 0x1c1   :  { %v651_v24 = vmax.f32 %v527_v20, 0.0 }
 0x1c2   :  { %v1262_v25 = vpack.c.bf16 %v653_v22, %v652_v21 }
 0x1c3   :  { %v1264_v27 = vpack.c.bf16 %v651_v24, %v650_v23  ;;  %v969_v28 = vpop.f32.mrb[4].mxu1 }
 0x1c4   :  { %v548_v29 = vadd.f32 %v969_v28, %v1256_v13  ;;  %v539_v30 = vpop.f32.mrb[5].mxu1 }
 0x1c5   :  { %v540_v31 = vadd.f32 %v1256_v13, %v539_v30  ;;  %v970_v32 = vpop.f32.mrb[6].mxu1 }
 0x1c6   :  { %v551_v33 = vadd.f32 %v970_v32, %v1256_v13  ;;  %v542_v34 = vpop.f32.mrb[7].mxu1  ;;  %v656_v36 = vmax.f32 %v548_v29, 0.0 }
 0x1c7   :  { %v543_v35 = vadd.f32 %v1256_v13, %v542_v34  ;;  %v654_v38 = vmax.f32 %v540_v31, 0.0 }
 0x1c8   :  { %v657_v37 = vmax.f32 %v551_v33, 0.0 }
 0x1c9   :  { %v655_v39 = vmax.f32 %v543_v35, 0.0 }
 0x1ca   :  { %v1270_v40 = vpack.c.bf16 %v657_v37, %v656_v36 }
 0x1cb   :  { %v1272_v41 = vpack.c.bf16 %v655_v39, %v654_v38  ;;  %v973_v42 = vpop.f32.mrb[8].mxu1 }
 0x1cc   :  { %v564_v43 = vadd.f32 %v973_v42, %v1256_v13  ;;  %v555_v44 = vpop.f32.mrb[9].mxu1 }
 0x1cd   :  { %v556_v45 = vadd.f32 %v1256_v13, %v555_v44  ;;  %v974_v46 = vpop.f32.mrb[10].mxu1 }
 0x1ce   :  { %v567_v47 = vadd.f32 %v974_v46, %v1256_v13  ;;  %v558_v48 = vpop.f32.mrb[11].mxu1  ;;  %v660_v50 = vmax.f32 %v564_v43, 0.0 }
 0x1cf   :  { %v559_v49 = vadd.f32 %v1256_v13, %v558_v48  ;;  %v658_v52 = vmax.f32 %v556_v45, 0.0 }
 0x1d0   :  { %v661_v51 = vmax.f32 %v567_v47, 0.0 }
 0x1d1   :  { %v659_v53 = vmax.f32 %v559_v49, 0.0 }
 0x1d2   :  { %v1278_v54 = vpack.c.bf16 %v661_v51, %v660_v50 }
 0x1d3   :  { %v1280_v55 = vpack.c.bf16 %v659_v53, %v658_v52  ;;  %v977_v56 = vpop.f32.mrb[12].mxu1 }
 0x1d4   :  { %v580_v57 = vadd.f32 %v977_v56, %v1256_v13  ;;  %v571_v58 = vpop.f32.mrb[13].mxu1 }
 0x1d5   :  { %v572_v59 = vadd.f32 %v1256_v13, %v571_v58  ;;  %v978_v60 = vpop.f32.mrb[14].mxu1 }
 0x1d6   :  { %v583_v61 = vadd.f32 %v978_v60, %v1256_v13  ;;  %v574_v62 = vpop.f32.mrb[15].mxu1  ;;  %v664_v0 = vmax.f32 %v580_v57, 0.0 }
 0x1d7   :  { %v575_v63 = vadd.f32 %v1256_v13, %v574_v62  ;;  %v662_v2 = vmax.f32 %v572_v59, 0.0 }
 0x1d8   :  { %v665_v1 = vmax.f32 %v583_v61, 0.0 }
 0x1d9   :  { %v663_v3 = vmax.f32 %v575_v63, 0.0 }
 0x1da   :  { %v1286_v4 = vpack.c.bf16 %v665_v1, %v664_v0 }
 0x1db   :  { %v1288_v5 = vpack.c.bf16 %v663_v3, %v662_v2  ;;  %v981_v6 = vpop.f32.mrb[16].mxu1 }
 0x1dc   :  { %v596_v7 = vadd.f32 %v981_v6, %v1256_v13  ;;  %v587_v8 = vpop.f32.mrb[17].mxu1  ;;  %v760_v6 = vlaneseq }
 0x1dd   :  { %v588_v9 = vadd.f32 %v1256_v13, %v587_v8  ;;  %v982_v10 = vpop.f32.mrb[18].mxu1 }
 0x1de   :  { %v599_v11 = vadd.f32 %v982_v10, %v1256_v13  ;;  %v590_v14 = vpop.f32.mrb[19].mxu1  ;;  %v668_v15 = vmax.f32 %v596_v7, 0.0  ;;  %v761_v8 = vshrl.u32 %v760_v6, 7  ;;  %vm774_vm1 = vcmp.lt.s32.totalorder %v760_v6, 256 }
 0x1df   :  { %v591_v26 = vadd.f32 %v1256_v13, %v590_v14  ;;  %v666_v17 = vmax.f32 %v588_v9, 0.0 }
 0x1e0   :  { %v669_v16 = vmax.f32 %v599_v11, 0.0 }
 0x1e1   :  { %v667_v18 = vmax.f32 %v591_v26, 0.0 }
 0x1e2   :  { %v999_v19 = vpack.c.bf16 %v669_v16, %v668_v15 }
 0x1e3   :  { %v995_v20 = vpack.c.bf16 %v667_v18, %v666_v17  ;;  %v985_v21 = vpop.f32.mrb[20].mxu1 }
 0x1e4   :  { %v612_v22 = vadd.f32 %v985_v21, %v1256_v13  ;;  %v603_v23 = vpop.f32.mrb[21].mxu1 }
 0x1e5   :  { %v604_v24 = vadd.f32 %v1256_v13, %v603_v23  ;;  %996 = vmatprep.subr.bf16.mxu0 %v995_v20  ;;  %v986_v28 = vpop.f32.mrb[22].mxu1 }
 0x1e6   :  { %v672_v29 = vmax.f32 %v612_v22, 0.0  ;;  %v615_v30 = vadd.f32 %v986_v28, %v1256_v13  ;;  %998 = vmatpush3.bf16.xpose.msra.mxu0 %v1264_v27  ;;  %v606_v31 = vpop.f32.mrb[23].mxu1 }
 0x1e7   :  { %v670_v32 = vmax.f32 %v604_v24, 0.0  ;;  %v607_v33 = vadd.f32 %v1256_v13, %v606_v31  ;;  %1000 = vmatprep.subr.bf16.mxu0 %v999_v19 }
 0x1e8   :  { %v673_v34 = vmax.f32 %v615_v30, 0.0 }
 0x1e9   :  { %v671_v35 = vmax.f32 %v607_v33, 0.0 }
 0x1ea   :  { %v1007_v36 = vpack.c.bf16 %v673_v34, %v672_v29 }
 0x1eb   :  { %v1003_v37 = vpack.c.bf16 %v671_v35, %v670_v32  ;;  %v989_v38 = vpop.f32.mrb[24].mxu1 }
 0x1ec   :  { %v628_v39 = vadd.f32 %v989_v38, %v1256_v13  ;;  %v619_v42 = vpop.f32.mrb[25].mxu1 }
 0x1ed   :  { %v620_v43 = vadd.f32 %v1256_v13, %v619_v42  ;;  %v990_v44 = vpop.f32.mrb[26].mxu1 }
 0x1ee   :  { %1002 = vmatpush3.bf16.xpose.msra.mxu0 %v1262_v25  ;;  %v676_v45 = vmax.f32 %v628_v39, 0.0  ;;  %v631_v27 = vadd.f32 %v990_v44, %v1256_v13  ;;  %v622_v46 = vpop.f32.mrb[27].mxu1 }
 0x1ef   :  { %1004 = vmatprep.subr.bf16.mxu0 %v1003_v37  ;;  %v674_v47 = vmax.f32 %v620_v43, 0.0  ;;  %v623_v48 = vadd.f32 %v1256_v13, %v622_v46 }
 0x1f0   :  { %v677_v49 = vmax.f32 %v631_v27, 0.0 }
 0x1f1   :  { %v675_v50 = vmax.f32 %v623_v48, 0.0 }
 0x1f2   :  { %v1015_v51 = vpack.c.bf16 %v677_v49, %v676_v45 }
 0x1f3   :  { %v1011_v52 = vpack.c.bf16 %v675_v50, %v674_v47  ;;  %v993_v53 = vpop.f32.mrb[28].mxu1 }
 0x1f4   :  { %v644_v56 = vadd.f32 %v993_v53, %v1256_v13  ;;  %v635_v57 = vpop.f32.mrb[29].mxu1 }
 0x1f5   :  { %v636_v58 = vadd.f32 %v1256_v13, %v635_v57  ;;  %v994_v59 = vpop.f32.mrb[30].mxu1 }
 0x1f6   :  { %1006 = vmatpush3.bf16.xpose.msra.mxu0 %v1272_v41  ;;  %v680_v25 = vmax.f32 %v644_v56, 0.0  ;;  %v647_v60 = vadd.f32 %v994_v59, %v1256_v13  ;;  %v638_v61 = vpop.f32.mrb[31].mxu1 }
 0x1f7   :  { %1008 = vmatprep.subr.bf16.mxu0 %v1007_v36  ;;  %v678_v62 = vmax.f32 %v636_v58, 0.0  ;;  %v639_v63 = vadd.f32 %v1256_v13, %v638_v61  ;;  %v1079_v13 = vmov 1966171168  }
 0x1f8   :  { %v681_v0 = vmax.f32 %v647_v60, 0.0  ;;  %v758_v41 = vunpack.c.l.s4 %v1079_v13 }
 0x1f9   :  { %v679_v1 = vmax.f32 %v639_v63, 0.0 }
 0x1fa   :  { %v1023_v2 = vpack.c.bf16 %v681_v0, %v680_v25  ;;  %v759_v7 = vunpack.c.0.s8 %v758_v41 }
 0x1fb   :  { %v1019_v3 = vpack.c.bf16 %v679_v1, %v678_v62 }
 0x1fc   :  { %v762_v9 = vsub.s32 %v759_v7, %v761_v8 }
 0x1fe   :  { %1010 = vmatpush3.bf16.xpose.msra.mxu0 %v1270_v40 }
 0x1ff   :  { %1012 = vmatprep.subr.bf16.mxu0 %v1011_v52 }
 0x206   :  { %1014 = vmatpush3.bf16.xpose.msra.mxu0 %v1280_v55 }
 0x207   :  { %1016 = vmatprep.subr.bf16.mxu0 %v1015_v51 }
 0x20e   :  { %1018 = vmatpush3.bf16.xpose.msra.mxu0 %v1278_v54 }
 0x20f   :  { %1020 = vmatprep.subr.bf16.mxu0 %v1019_v3 }
 0x216   :  { %1022 = vmatpush3.bf16.xpose.msra.mxu0 %v1288_v5 }
 0x217   :  { %1024 = vmatprep.subr.bf16.mxu0 %v1023_v2 }
 0x21e   :  { %1026 = vmatpush3.bf16.xpose.msra.mxu0 %v1286_v4 }
 0x225   :  { %910 = vmatmul.mubr.f32.vlgmr.msra.gmra.mrb[32].mxu0 %v1250_v12 }
 0x2f8   :  { %v749_v40 = vpop.f32.mrb[32].mxu0 }
 0x2f9   :  { %v751_v10 = vpop.f32.mrb[33].mxu0 }
 0x2fa   :  { %v756_v55 = vcombine.low %v749_v40, %v751_v10 }
 0x2fc   :  { %v763_v54 = vrot.slane %v756_v55, %v762_v9 }
 0x2fe   :  { %v770_v11 = vrot.slane %v763_v54, %v762_v9 }
 0x300   :  { %776 = vst.msk [vmem:[#allocation2] sm:$0x3] %vm774_vm1, %v770_v11 }
 0x301   :  { %1066 = shalt.err (!%p1063_p4)
}
 0x302   :  { %s1067_s29 = scalar_lea.hbm %s1333_s6, 32 }
 0x303   :  { %p1068_p5 = scmp.ne.s32.totalorder %s1333_s6, %s1067_s29  ;;  %p1071_p6 = scmp.lt.u32.totalorder %s1067_s29, %s1333_s6 }
 0x305   :  { %p1073_p7 = pnand %p1071_p6, %p1068_p5 }
 0x307   :  { %1076 = shalt.err (!%p1073_p7)
}
 0x308   :  { %786 = dma.vmem_to_hbm [thread:$0]  %s784_s5, 32, %s1333_s6, [#allocation3]  }
 0x309   :  { %1077 = dma.done.wait [#allocation3], 32  }
 0x30a   :  { %1078 = vsyncadd [#allocation3], 4294967264 }
 0x30b   :  { %790 = vsyncpa [#allocation3], 1 }

</bundles_post_ra>
